<compile_context>
chip_gen: v7x
topology: tpu7x:2x2x1
jax: 0.10.0
libtpu: 0.0.40
codegen_flags: <defaults>
</compile_context>

<pallas_src>
import jax
import jax.numpy as jnp
from jax.experimental import pallas as pl
from jax.experimental.pallas import tpu as pltpu

LANE = 128          # TPU lane width: internal (weight-side) dims pad to this
TB_MAX = 512        # max batch rows per grid step


def _round_up(n, m):
    return ((n + m - 1) // m) * m


def _cdiv(a, b):
    return (a + b - 1) // b


# --------------------------------------------------------------------------- #
# Kernel: one (TB, D) batch tile through all six linear layers.
# Weights are bf16 (internal dims zero-padded to 128 lanes), matmuls
# accumulate in f32 on the MXU, epilogue is f32.
# --------------------------------------------------------------------------- #
def autoencoder_kernel(x_ref,
                       w1, b1, w2, b2, w3, b3,
                       w4, b4, w5, b5, w6, b6,
                       out_ref):
    cd = w1.dtype                       # matmul-input dtype (bf16 or f32)
    x = x_ref[...]                      # (TB, D), true feature width

    # ---- encoder (Dropout = identity in eval mode) ----
    h = jnp.dot(x.astype(cd), w1[...], preferred_element_type=jnp.float32) + b1[...]
    h = jnp.maximum(h, 0.0)
    h = jnp.dot(h.astype(cd), w2[...], preferred_element_type=jnp.float32) + b2[...]
    h = jnp.maximum(h, 0.0)
    z = jnp.dot(h.astype(cd), w3[...], preferred_element_type=jnp.float32) + b3[...]
    # (eval-mode BatchNorm1d is already folded into w3 / b3)

    # ---- decoder ----
    h = jnp.dot(z.astype(cd), w4[...], preferred_element_type=jnp.float32) + b4[...]
    h = jnp.maximum(h, 0.0)
    h = jnp.dot(h.astype(cd), w5[...], preferred_element_type=jnp.float32) + b5[...]
    h = jnp.maximum(h, 0.0)
    y = jnp.dot(h.astype(cd), w6[...], preferred_element_type=jnp.float32) + b6[...]

    out_ref[...] = y.astype(out_ref.dtype)


# --------------------------------------------------------------------------- #
# Wrapper: batch grid with resident weights, no host-side pad/slice passes.
# --------------------------------------------------------------------------- #
def autoencoder_forward(x, params, out_dtype=None):
    """x: (B, D) array. params: folded/padded tuple from prepare_params."""
    B, D = x.shape
    w1, w6 = params[0], params[10]
    assert w1.shape[0] == D, "w1 must be (D, 128)"
    assert w6.shape[1] == D, "w6 must be (128, D)"
    out_dtype = x.dtype if out_dtype is None else out_dtype

    # ---- batch tile selection (no batch padding; partial last tile is OK) ----
    if B <= 8:
        TB = B                                        # block == full batch dim
    elif B <= 2 * TB_MAX:
        # At least two blocks so both v7x TensorCores get work.
        TB = min(TB_MAX, _round_up(_cdiv(B, 2), 8))
    else:
        TB = TB_MAX
    # Keep double-buffered x/out tiles comfortably inside scoped VMEM.
    bytes_per_row = D * (jnp.dtype(x.dtype).itemsize + jnp.dtype(out_dtype).itemsize)
    vmem_cap_rows = max(8, (8 * 1024 * 1024) // max(bytes_per_row, 1))
    if TB > vmem_cap_rows:
        TB = max(8, (vmem_cap_rows // 8) * 8)

    grid = (_cdiv(B, TB),)

    x_spec = pl.BlockSpec((TB, D), lambda i: (i, 0))
    out_spec = pl.BlockSpec((TB, D), lambda i: (i, 0))
    # Weights/biases: constant block index -> fetched once, VMEM-resident.
    param_specs = [pl.BlockSpec(p.shape, lambda i: (0, 0)) for p in params]

    out = pl.pallas_call(
        autoencoder_kernel,
        out_shape=jax.ShapeDtypeStruct((B, D), out_dtype),
        grid_spec=pltpu.PrefetchScalarGridSpec(
            num_scalar_prefetch=0,
            grid=grid,
            in_specs=[x_spec] + param_specs,
            out_specs=out_spec),
        compiler_params=pltpu.CompilerParams(
            dimension_semantics=("parallel",),     # shard batch over TCs (v7x)
            vmem_limit_bytes=32 * 1024 * 1024),
    )(x, *params)

    return out


# --------------------------------------------------------------------------- #
# Parameter construction (mimics the PyTorch module's shapes / init ranges).
# --------------------------------------------------------------------------- #
def init_raw_params(key, input_dim, z_dim):
    """Raw f32 params in PyTorch layout: per-layer (W[in,out], b[out]) + BN."""
    def linear(k, fan_in, fan_out):
        kw, kb = jax.random.split(k)
        bound = 1.0 / jnp.sqrt(fan_in)
        w = jax.random.uniform(kw, (fan_in, fan_out), jnp.float32, -bound, bound)
        b = jax.random.uniform(kb, (fan_out,), jnp.float32, -bound, bound)
        return w, b

    keys = jax.random.split(key, 7)
    linears = (
        linear(keys[0], input_dim, 128),
        linear(keys[1], 128, 64),
        linear(keys[2], 64, z_dim),
        linear(keys[3], z_dim, 64),
        linear(keys[4], 64, 128),
        linear(keys[5], 128, input_dim),
    )
    gamma = jax.random.uniform(keys[6], (z_dim,), jnp.float32, 0.5, 1.5)
    beta = jnp.zeros((z_dim,), jnp.float32)
    running_mean = jnp.zeros((z_dim,), jnp.float32)
    running_var = jnp.ones((z_dim,), jnp.float32)
    return {"linears": linears, "bn": (gamma, beta, running_mean, running_var)}


def prepare_params(raw, weight_dtype=jnp.bfloat16):
    """Fold eval-mode BN into w3/b3, pad internal dims to 128 lanes, cast weights.

    The input/output feature dim D is NOT padded (w1 is (D,128), w6 is (128,D)),
    so activations stream through HBM at their true width.
    """
    eps = 1e-5
    (w1, b1), (w2, b2), (w3, b3), (w4, b4), (w5, b5), (w6, b6) = raw["linears"]
    gamma, beta, rmean, rvar = raw["bn"]

    # Fold BatchNorm1d (eval) into the preceding Linear.
    bn_scale = gamma / jnp.sqrt(rvar + eps)
    bn_shift = beta - rmean * bn_scale
    w3 = w3 * bn_scale[None, :]
    b3 = b3 * bn_scale + bn_shift

    D = w1.shape[0]
    Z = w3.shape[1]
    H1 = 128                       # already lane-aligned
    H2 = _round_up(64, LANE)       # 64  -> 128 (zero-padded, exact through ReLU)
    Zp = _round_up(Z, LANE)        # Z   -> 128

    def prep(w, b, rin, rout):
        wp = jnp.zeros((rin, rout), jnp.float32)
        wp = wp.at[:w.shape[0], :w.shape[1]].set(w).astype(weight_dtype)
        bp = jnp.zeros((1, rout), jnp.float32).at[0, :b.shape[0]].set(b)
        return wp, bp

    w1, b1 = prep(w1, b1, D,  H1)   # (D, 128)   -- input dim not padded
    w2, b2 = prep(w2, b2, H1, H2)
    w3, b3 = prep(w3, b3, H2, Zp)
    w4, b4 = prep(w4, b4, Zp, H2)
    w5, b5 = prep(w5, b5, H2, H1)
    w6, b6 = prep(w6, b6, H1, D)    # (128, D)   -- output dim not padded
    return (w1, b1, w2, b2, w3, b3, w4, b4, w5, b5, w6, b6)


# --------------------------------------------------------------------------- #
# References for correctness checks.
# --------------------------------------------------------------------------- #
def reference_forward_prepared(x, params):
    """Pure-JAX mirror of the kernel math (same padded params & dtype casts)."""
    (w1, b1, w2, b2, w3, b3, w4, b4, w5, b5, w6, b6) = params
    cd = w1.dtype

    def lin(h, w, b):
        return jnp.dot(h.astype(cd), w, preferred_element_type=jnp.float32) + b

    h = jnp.maximum(lin(x.astype(jnp.float32), w1, b1), 0.0)
    h = jnp.maximum(lin(h, w2, b2), 0.0)
    z = lin(h, w3, b3)
    h = jnp.maximum(lin(z, w4, b4), 0.0)
    h = jnp.maximum(lin(h, w5, b5), 0.0)
    return lin(h, w6, b6)


def reference_forward_f32(x, raw):
    """Full-f32 PyTorch-eval-mode reference (unpadded, BN applied explicitly)."""
    eps = 1e-5
    (w1, b1), (w2, b2), (w3, b3), (w4, b4), (w5, b5), (w6, b6) = raw["linears"]
    gamma, beta, rmean, rvar = raw["bn"]
    h = jnp.maximum(x @ w1 + b1, 0.0)
    h = jnp.maximum(h @ w2 + b2, 0.0)
    z = h @ w3 + b3
    z = (z - rmean) / jnp.sqrt(rvar + eps) * gamma + beta
    h = jnp.maximum(z @ w4 + b4, 0.0)
    h = jnp.maximum(h @ w5 + b5, 0.0)
    return h @ w6 + b6


if __name__ == "__main__":
    B, INPUT_DIM, Z_DIM = 8, 32, 8

    key = jax.random.PRNGKey(0)
    kx, kp = jax.random.split(key)
    x = jax.random.normal(kx, (B, INPUT_DIM), jnp.float32)

    raw = init_raw_params(kp, INPUT_DIM, Z_DIM)
    params = prepare_params(raw, weight_dtype=jnp.bfloat16)

    out = autoencoder_forward(x, params)
    out = jax.block_until_ready(out)
    assert out.shape == (B, INPUT_DIM)
    assert out.dtype == x.dtype

    # Tight check vs a pure-JAX mirror using identical (bf16) params/casts.
    ref_same = reference_forward_prepared(x, params)
    assert jnp.allclose(out, ref_same, atol=1e-3, rtol=1e-3), \
        "mismatch vs same-precision reference"

    # Looser check vs the full-f32 PyTorch-semantics reference (bf16 weights
    # introduce small quantization error).
    ref_f32 = reference_forward_f32(x, raw)
    assert jnp.allclose(out, ref_f32, atol=5e-2, rtol=5e-2), \
        "mismatch vs f32 reference"

    # Exercise the partial-tile path (B not a multiple of the batch tile):
    # grid = cdiv(B, TB) with Pallas masking the out-of-bounds rows.
    x2 = jax.random.normal(jax.random.PRNGKey(1), (10, INPUT_DIM), jnp.float32)
    out2 = jax.block_until_ready(autoencoder_forward(x2, params))
    assert out2.shape == (10, INPUT_DIM)
    ref2 = reference_forward_prepared(x2, params)
    assert jnp.allclose(out2, ref2, atol=1e-3, rtol=1e-3), \
        "mismatch on partial-tile batch"

    print("KERNEL_OK")
</pallas_src>

<mosaic_0001>
module attributes {stable_mosaic.version = 11 : i64} {
  func.func @autoencoder_kernel(%arg0: i32, %arg1: memref<8x32xf32, #tpu.memory_space<vmem>>, %arg2: memref<32x128xbf16, #tpu.memory_space<vmem>>, %arg3: memref<1x128xf32, #tpu.memory_space<vmem>>, %arg4: memref<128x128xbf16, #tpu.memory_space<vmem>>, %arg5: memref<1x128xf32, #tpu.memory_space<vmem>>, %arg6: memref<128x128xbf16, #tpu.memory_space<vmem>>, %arg7: memref<1x128xf32, #tpu.memory_space<vmem>>, %arg8: memref<128x128xbf16, #tpu.memory_space<vmem>>, %arg9: memref<1x128xf32, #tpu.memory_space<vmem>>, %arg10: memref<128x128xbf16, #tpu.memory_space<vmem>>, %arg11: memref<1x128xf32, #tpu.memory_space<vmem>>, %arg12: memref<128x32xbf16, #tpu.memory_space<vmem>>, %arg13: memref<1x32xf32, #tpu.memory_space<vmem>>, %arg14: memref<8x32xf32, #tpu.memory_space<vmem>>) attributes {dimension_semantics = [#tpu.dimension_semantics<parallel>], iteration_bounds = array<i64: 1>, scalar_prefetch = 0 : i64, scratch_operands = 0 : i64, tpu.core_type = #tpu.core_type<tc>, window_params = [{transform_indices = @transform_0, window_bounds = array<i64: 8, 32>}, {pipeline_mode = #tpu.pipeline_mode<synchronous>, transform_indices = @transform_1, window_bounds = array<i64: 32, 128>}, {pipeline_mode = #tpu.pipeline_mode<synchronous>, transform_indices = @transform_2, window_bounds = array<i64: 1, 128>}, {pipeline_mode = #tpu.pipeline_mode<synchronous>, transform_indices = @transform_3, window_bounds = array<i64: 128, 128>}, {pipeline_mode = #tpu.pipeline_mode<synchronous>, transform_indices = @transform_4, window_bounds = array<i64: 1, 128>}, {pipeline_mode = #tpu.pipeline_mode<synchronous>, transform_indices = @transform_5, window_bounds = array<i64: 128, 128>}, {pipeline_mode = #tpu.pipeline_mode<synchronous>, transform_indices = @transform_6, window_bounds = array<i64: 1, 128>}, {pipeline_mode = #tpu.pipeline_mode<synchronous>, transform_indices = @transform_7, window_bounds = array<i64: 128, 128>}, {pipeline_mode = #tpu.pipeline_mode<synchronous>, transform_indices = @transform_8, window_bounds = array<i64: 1, 128>}, {pipeline_mode = #tpu.pipeline_mode<synchronous>, transform_indices = @transform_9, window_bounds = array<i64: 128, 128>}, {pipeline_mode = #tpu.pipeline_mode<synchronous>, transform_indices = @transform_10, window_bounds = array<i64: 1, 128>}, {pipeline_mode = #tpu.pipeline_mode<synchronous>, transform_indices = @transform_11, window_bounds = array<i64: 128, 32>}, {pipeline_mode = #tpu.pipeline_mode<synchronous>, transform_indices = @transform_12, window_bounds = array<i64: 1, 32>}, {transform_indices = @transform_13, window_bounds = array<i64: 8, 32>}]} {
    %c0 = arith.constant 0 : index
    %c0_0 = arith.constant 0 : index
    %0 = vector.load %arg1[%c0, %c0_0] : memref<8x32xf32, #tpu.memory_space<vmem>>, vector<8x32xf32>
    %1 = arith.truncf %0 : vector<8x32xf32> to vector<8x32xbf16>
    %c0_1 = arith.constant 0 : index
    %c0_2 = arith.constant 0 : index
    %2 = vector.load %arg2[%c0_1, %c0_2] : memref<32x128xbf16, #tpu.memory_space<vmem>>, vector<32x128xbf16>
    %cst = arith.constant dense<0.000000e+00> : vector<8x128xf32>
    %3 = tpu.matmul %1, %2, %cst {dimension_numbers = #tpu.dot_dimension_numbers<[1], [0], [0], [1], [0, 0, 1, 1], [], []>} : vector<8x32xbf16>, vector<32x128xbf16>, vector<8x128xf32> -> vector<8x128xf32>
    %c0_3 = arith.constant 0 : index
    %c0_4 = arith.constant 0 : index
    %4 = vector.load %arg3[%c0_3, %c0_4] : memref<1x128xf32, #tpu.memory_space<vmem>>, vector<1x128xf32>
    %5 = vector.broadcast %4 : vector<1x128xf32> to vector<8x128xf32>
    %6 = arith.addf %3, %5 : vector<8x128xf32>
    %cst_5 = arith.constant 0.000000e+00 : f32
    %7 = vector.broadcast %cst_5 : f32 to vector<8x128xf32>
    %8 = arith.maximumf %6, %7 : vector<8x128xf32>
    %9 = arith.truncf %8 : vector<8x128xf32> to vector<8x128xbf16>
    %c0_6 = arith.constant 0 : index
    %c0_7 = arith.constant 0 : index
    %10 = vector.load %arg4[%c0_6, %c0_7] : memref<128x128xbf16, #tpu.memory_space<vmem>>, vector<128x128xbf16>
    %cst_8 = arith.constant dense<0.000000e+00> : vector<8x128xf32>
    %11 = tpu.matmul %9, %10, %cst_8 {dimension_numbers = #tpu.dot_dimension_numbers<[1], [0], [0], [1], [0, 0, 1, 1], [], []>} : vector<8x128xbf16>, vector<128x128xbf16>, vector<8x128xf32> -> vector<8x128xf32>
    %c0_9 = arith.constant 0 : index
    %c0_10 = arith.constant 0 : index
    %12 = vector.load %arg5[%c0_9, %c0_10] : memref<1x128xf32, #tpu.memory_space<vmem>>, vector<1x128xf32>
    %13 = vector.broadcast %12 : vector<1x128xf32> to vector<8x128xf32>
    %14 = arith.addf %11, %13 : vector<8x128xf32>
    %cst_11 = arith.constant 0.000000e+00 : f32
    %15 = vector.broadcast %cst_11 : f32 to vector<8x128xf32>
    %16 = arith.maximumf %14, %15 : vector<8x128xf32>
    %17 = arith.truncf %16 : vector<8x128xf32> to vector<8x128xbf16>
    %c0_12 = arith.constant 0 : index
    %c0_13 = arith.constant 0 : index
    %18 = vector.load %arg6[%c0_12, %c0_13] : memref<128x128xbf16, #tpu.memory_space<vmem>>, vector<128x128xbf16>
    %cst_14 = arith.constant dense<0.000000e+00> : vector<8x128xf32>
    %19 = tpu.matmul %17, %18, %cst_14 {dimension_numbers = #tpu.dot_dimension_numbers<[1], [0], [0], [1], [0, 0, 1, 1], [], []>} : vector<8x128xbf16>, vector<128x128xbf16>, vector<8x128xf32> -> vector<8x128xf32>
    %c0_15 = arith.constant 0 : index
    %c0_16 = arith.constant 0 : index
    %20 = vector.load %arg7[%c0_15, %c0_16] : memref<1x128xf32, #tpu.memory_space<vmem>>, vector<1x128xf32>
    %21 = vector.broadcast %20 : vector<1x128xf32> to vector<8x128xf32>
    %22 = arith.addf %19, %21 : vector<8x128xf32>
    %23 = arith.truncf %22 : vector<8x128xf32> to vector<8x128xbf16>
    %c0_17 = arith.constant 0 : index
    %c0_18 = arith.constant 0 : index
    %24 = vector.load %arg8[%c0_17, %c0_18] : memref<128x128xbf16, #tpu.memory_space<vmem>>, vector<128x128xbf16>
    %cst_19 = arith.constant dense<0.000000e+00> : vector<8x128xf32>
    %25 = tpu.matmul %23, %24, %cst_19 {dimension_numbers = #tpu.dot_dimension_numbers<[1], [0], [0], [1], [0, 0, 1, 1], [], []>} : vector<8x128xbf16>, vector<128x128xbf16>, vector<8x128xf32> -> vector<8x128xf32>
    %c0_20 = arith.constant 0 : index
    %c0_21 = arith.constant 0 : index
    %26 = vector.load %arg9[%c0_20, %c0_21] : memref<1x128xf32, #tpu.memory_space<vmem>>, vector<1x128xf32>
    %27 = vector.broadcast %26 : vector<1x128xf32> to vector<8x128xf32>
    %28 = arith.addf %25, %27 : vector<8x128xf32>
    %cst_22 = arith.constant 0.000000e+00 : f32
    %29 = vector.broadcast %cst_22 : f32 to vector<8x128xf32>
    %30 = arith.maximumf %28, %29 : vector<8x128xf32>
    %31 = arith.truncf %30 : vector<8x128xf32> to vector<8x128xbf16>
    %c0_23 = arith.constant 0 : index
    %c0_24 = arith.constant 0 : index
    %32 = vector.load %arg10[%c0_23, %c0_24] : memref<128x128xbf16, #tpu.memory_space<vmem>>, vector<128x128xbf16>
    %cst_25 = arith.constant dense<0.000000e+00> : vector<8x128xf32>
    %33 = tpu.matmul %31, %32, %cst_25 {dimension_numbers = #tpu.dot_dimension_numbers<[1], [0], [0], [1], [0, 0, 1, 1], [], []>} : vector<8x128xbf16>, vector<128x128xbf16>, vector<8x128xf32> -> vector<8x128xf32>
    %c0_26 = arith.constant 0 : index
    %c0_27 = arith.constant 0 : index
    %34 = vector.load %arg11[%c0_26, %c0_27] : memref<1x128xf32, #tpu.memory_space<vmem>>, vector<1x128xf32>
    %35 = vector.broadcast %34 : vector<1x128xf32> to vector<8x128xf32>
    %36 = arith.addf %33, %35 : vector<8x128xf32>
    %cst_28 = arith.constant 0.000000e+00 : f32
    %37 = vector.broadcast %cst_28 : f32 to vector<8x128xf32>
    %38 = arith.maximumf %36, %37 : vector<8x128xf32>
    %39 = arith.truncf %38 : vector<8x128xf32> to vector<8x128xbf16>
    %c0_29 = arith.constant 0 : index
    %c0_30 = arith.constant 0 : index
    %40 = vector.load %arg12[%c0_29, %c0_30] : memref<128x32xbf16, #tpu.memory_space<vmem>>, vector<128x32xbf16>
    %cst_31 = arith.constant dense<0.000000e+00> : vector<8x32xf32>
    %41 = tpu.matmul %39, %40, %cst_31 {dimension_numbers = #tpu.dot_dimension_numbers<[1], [0], [0], [1], [0, 0, 1, 1], [], []>} : vector<8x128xbf16>, vector<128x32xbf16>, vector<8x32xf32> -> vector<8x32xf32>
    %c0_32 = arith.constant 0 : index
    %c0_33 = arith.constant 0 : index
    %42 = vector.load %arg13[%c0_32, %c0_33] : memref<1x32xf32, #tpu.memory_space<vmem>>, vector<1x32xf32>
    %43 = vector.broadcast %42 : vector<1x32xf32> to vector<8x32xf32>
    %44 = arith.addf %41, %43 : vector<8x32xf32>
    %c0_34 = arith.constant 0 : index
    %c0_35 = arith.constant 0 : index
    %45 = vector.load %arg14[%c0_34, %c0_35] : memref<8x32xf32, #tpu.memory_space<vmem>>, vector<8x32xf32>
    tpu.vector_store %arg14[%c0_34, %c0_35], %44 {strides = array<i32>} : memref<8x32xf32, #tpu.memory_space<vmem>>, vector<8x32xf32>,
    return
  }
  func.func @transform_0(%arg0: i32) -> (i32, i32) {
    %c0_i32 = arith.constant 0 : i32
    %c0_i32_0 = arith.constant 0 : i32
    return %arg0, %c0_i32 : i32, i32
  }
  func.func @transform_1(%arg0: i32) -> (i32, i32) {
    %c0_i32 = arith.constant 0 : i32
    %c0_i32_0 = arith.constant 0 : i32
    %c0_i32_1 = arith.constant 0 : i32
    return %c0_i32, %c0_i32_0 : i32, i32
  }
  func.func @transform_2(%arg0: i32) -> (i32, i32) {
    %c0_i32 = arith.constant 0 : i32
    %c0_i32_0 = arith.constant 0 : i32
    %c0_i32_1 = arith.constant 0 : i32
    return %c0_i32, %c0_i32_0 : i32, i32
  }
  func.func @transform_3(%arg0: i32) -> (i32, i32) {
    %c0_i32 = arith.constant 0 : i32
    %c0_i32_0 = arith.constant 0 : i32
    %c0_i32_1 = arith.constant 0 : i32
    return %c0_i32, %c0_i32_0 : i32, i32
  }
  func.func @transform_4(%arg0: i32) -> (i32, i32) {
    %c0_i32 = arith.constant 0 : i32
    %c0_i32_0 = arith.constant 0 : i32
    %c0_i32_1 = arith.constant 0 : i32
    return %c0_i32, %c0_i32_0 : i32, i32
  }
  func.func @transform_5(%arg0: i32) -> (i32, i32) {
    %c0_i32 = arith.constant 0 : i32
    %c0_i32_0 = arith.constant 0 : i32
    %c0_i32_1 = arith.constant 0 : i32
    return %c0_i32, %c0_i32_0 : i32, i32
  }
  func.func @transform_6(%arg0: i32) -> (i32, i32) {
    %c0_i32 = arith.constant 0 : i32
    %c0_i32_0 = arith.constant 0 : i32
    %c0_i32_1 = arith.constant 0 : i32
    return %c0_i32, %c0_i32_0 : i32, i32
  }
  func.func @transform_7(%arg0: i32) -> (i32, i32) {
    %c0_i32 = arith.constant 0 : i32
    %c0_i32_0 = arith.constant 0 : i32
    %c0_i32_1 = arith.constant 0 : i32
    return %c0_i32, %c0_i32_0 : i32, i32
  }
  func.func @transform_8(%arg0: i32) -> (i32, i32) {
    %c0_i32 = arith.constant 0 : i32
    %c0_i32_0 = arith.constant 0 : i32
    %c0_i32_1 = arith.constant 0 : i32
    return %c0_i32, %c0_i32_0 : i32, i32
  }
  func.func @transform_9(%arg0: i32) -> (i32, i32) {
    %c0_i32 = arith.constant 0 : i32
    %c0_i32_0 = arith.constant 0 : i32
    %c0_i32_1 = arith.constant 0 : i32
    return %c0_i32, %c0_i32_0 : i32, i32
  }
  func.func @transform_10(%arg0: i32) -> (i32, i32) {
    %c0_i32 = arith.constant 0 : i32
    %c0_i32_0 = arith.constant 0 : i32
    %c0_i32_1 = arith.constant 0 : i32
    return %c0_i32, %c0_i32_0 : i32, i32
  }
  func.func @transform_11(%arg0: i32) -> (i32, i32) {
    %c0_i32 = arith.constant 0 : i32
    %c0_i32_0 = arith.constant 0 : i32
    %c0_i32_1 = arith.constant 0 : i32
    return %c0_i32, %c0_i32_0 : i32, i32
  }
  func.func @transform_12(%arg0: i32) -> (i32, i32) {
    %c0_i32 = arith.constant 0 : i32
    %c0_i32_0 = arith.constant 0 : i32
    %c0_i32_1 = arith.constant 0 : i32
    return %c0_i32, %c0_i32_0 : i32, i32
  }
  func.func @transform_13(%arg0: i32) -> (i32, i32) {
    %c0_i32 = arith.constant 0 : i32
    %c0_i32_0 = arith.constant 0 : i32
    return %arg0, %c0_i32 : i32, i32
  }
}

</mosaic_0001>

<bundles_post_ra>
// kernel: tpu_custom_call.1
= control target key start
LH: loop header
LB: loop body
LE: loop exit
PB: predicated region body
PF: predicated region fallthrough
CT: control target
= control target key end

     0   :  { %18 = vsyncpa [#allocation3], 0  ;;  %s1359_s0 = inlined_call_operand.vmem [shape: f32[8,32], index: 0, kind: input, shape index: {}]   ;;  %s1360_s1 = inlined_call_operand.vmem [shape: bf16[32,128], index: 1, kind: input, shape index: {}]   ;;  %s1361_s2 = inlined_call_operand.vmem [shape: f32[1,128], index: 2, kind: input, shape index: {}]   ;;  %s1362_s3 = inlined_call_operand.vmem [shape: bf16[128,128], index: 3, kind: input, shape index: {}]   ;;  %s1363_s4 = inlined_call_operand.vmem [shape: f32[1,128], index: 4, kind: input, shape index: {}]   ;;  %s1364_s5 = inlined_call_operand.hbm [shape: bf16[128,128], index: 5, kind: input, shape index: {}]   ;;  %s1365_s6 = inlined_call_operand.vmem [shape: f32[1,128], index: 6, kind: input, shape index: {}]   ;;  %s1366_s7 = inlined_call_operand.hbm [shape: bf16[128,128], index: 7, kind: input, shape index: {}]   ;;  %s1367_s8 = inlined_call_operand.vmem [shape: f32[1,128], index: 8, kind: input, shape index: {}]   ;;  %s1368_s9 = inlined_call_operand.hbm [shape: bf16[128,128], index: 9, kind: input, shape index: {}]   ;;  %s1369_s10 = inlined_call_operand.vmem [shape: f32[1,128], index: 10, kind: input, shape index: {}]   ;;  %s1370_s11 = inlined_call_operand.vmem [shape: bf16[128,32], index: 11, kind: input, shape index: {}]   ;;  %s1371_s12 = inlined_call_operand.vmem [shape: f32[1,32], index: 12, kind: input, shape index: {}]   ;;  %s1372_s13 = inlined_call_operand.hbm [shape: f32[8,32], index: 13, kind: output, shape index: {}]  }
   0x1   :  { %19 = vsyncpa [#allocation6], 0 }
   0x2   :  { %20 = vsyncpa [#allocation4], 0  ;;  %s1086_s25 = smov [#allocation5]   ;;  %s1087_s27 = smov [#allocation2]  }
   0x3   :  { %s50_s26 = sshll.u32 %s1086_s25, 4  ;;  %s36_s28 = sshll.u32 %s1087_s27, 4  ;;  %s51_s26 = int_to_ptr.vmem [resolvable:$true] %s50_s26  ;;  %s1164_s28 = int_to_ptr.vmem [resolvable:$true] %s36_s28 }
   0x4   :  { %s992_s14 = scalar_lea.hbm %s1366_s7, 1024 }
   0x5   :  { %p993_p0 = scmp.ne.s32.totalorder %s1366_s7, %s992_s14  ;;  %p996_p1 = scmp.lt.u32.totalorder %s992_s14, %s1366_s7 }
   0x7   :  { %p998_p2 = pnand %p996_p1, %p993_p0 }
   0x9   :  { %1001 = shalt.err (!%p998_p2)
}
   0xa   :  { %s1002_s19 = scalar_lea.vmem %s51_s26, 1024  ;;  %p1007_p4 = scmp.lt.s32.totalorder %s51_s26, %s51_s26 }
   0xb   :  { %p1003_p3 = scmp.ne.s32.totalorder %s51_s26, %s1002_s19  ;;  %p1008_p5 = scmp.lt.s32.totalorder %s1002_s19, %s1002_s19 }
   0xd   :  { %p1009_p6 = por %p1008_p5, %p1007_p4 }
   0xf   :  { %p1010_p7 = pnand %p1009_p6, %p1003_p3 }
  0x11   :  { %1013 = shalt.err (!%p1010_p7)
}
  0x12   :  { %s1088_s20 = smov 64   ;;  %s1089_s21 = smov 4  }
  0x13   :  { %56 = dma.hbm_to_vmem [thread:$0]  %s1366_s7, 1024, %s51_s26, [#allocation6], %s1088_s20, %s1088_s20, %s1089_s21  }
  0x14   :  { %s1014_s27 = scalar_lea.hbm %s1364_s5, 1024 }
  0x15   :  { %p1015_p8 = scmp.ne.s32.totalorder %s1364_s5, %s1014_s27  ;;  %p1018_p9 = scmp.lt.u32.totalorder %s1014_s27, %s1364_s5 }
  0x17   :  { %p1020_p10 = pnand %p1018_p9, %p1015_p8 }
  0x19   :  { %1023 = shalt.err (!%p1020_p10)
}
  0x1a   :  { %s1024_s16 = scalar_lea.vmem %s1164_s28, 1024  ;;  %p1029_p12 = scmp.lt.s32.totalorder %s1164_s28, %s1164_s28 }
  0x1b   :  { %p1025_p11 = scmp.ne.s32.totalorder %s1164_s28, %s1024_s16  ;;  %p1030_p13 = scmp.lt.s32.totalorder %s1024_s16, %s1024_s16 }
  0x1d   :  { %p1031_p0 = por %p1030_p13, %p1029_p12 }
  0x1f   :  { %p1032_p1 = pnand %p1031_p0, %p1025_p11 }
  0x21   :  { %1035 = shalt.err (!%p1032_p1)
}
  0x22   :  { %42 = dma.hbm_to_vmem [thread:$0]  %s1364_s5, 1024, %s1164_s28, [#allocation3], %s1088_s20, %s1088_s20, %s1089_s21  }
  0x23   :  { %s1090_s17 = smov [#allocation7]   ;;  %s1036_s23 = scalar_lea.hbm %s1368_s9, 1024 }
  0x24   :  { %s64_s18 = sshll.u32 %s1090_s17, 4  ;;  %p1037_p2 = scmp.ne.s32.totalorder %s1368_s9, %s1036_s23  ;;  %s65_s18 = int_to_ptr.vmem [resolvable:$true] %s64_s18 }
  0x25   :  { %p1040_p3 = scmp.lt.u32.totalorder %s1036_s23, %s1368_s9 }
  0x27   :  { %p1042_p4 = pnand %p1040_p3, %p1037_p2 }
  0x29   :  { %1045 = shalt.err (!%p1042_p4)
}
  0x2a   :  { %s1046_s30 = scalar_lea.vmem %s65_s18, 1024  ;;  %p1051_p6 = scmp.lt.s32.totalorder %s65_s18, %s65_s18 }
  0x2b   :  { %p1047_p5 = scmp.ne.s32.totalorder %s65_s18, %s1046_s30  ;;  %p1052_p7 = scmp.lt.s32.totalorder %s1046_s30, %s1046_s30 }
  0x2d   :  { %p1053_p8 = por %p1052_p7, %p1051_p6 }
  0x2f   :  { %p1054_p9 = pnand %p1053_p8, %p1047_p5 }
  0x31   :  { %1057 = shalt.err (!%p1054_p9)
}
  0x32   :  { %70 = dma.hbm_to_vmem [thread:$0]  %s1368_s9, 1024, %s65_s18, [#allocation6], %s1088_s20, %s1088_s20, %s1089_s21  }
  0x33   :  { %1080 = dma.done.wait [#allocation3], 1024  }
  0x34   :  { %1081 = vsyncadd [#allocation3], 4294966272 }
  0x35   :  { %1082 = dma.done.wait [#allocation6], 2048  }
  0x36   :  { %1083 = vsyncadd [#allocation6], 4294965248  ;;  %v1091_v0 = vmov 0.0   ;;  %vm1092_vm0 = vmmov 0   ;;  %v950_v1 = vld [vmem:[%s1360_s1] sm:$0xff]   ;;  %v951_v2 = vld [vmem:[%s1360_s1 + $0x8] sm:$0xff]  }
  0x37   :  { %834 = vmatprep.subr.bf16.mxu0 %v1091_v0  ;;  %838 = vmatprep.mubr.msk.bf16.mxu0 %vm1092_vm0, %v1091_v0  ;;  %v87_v3 = vld [vmem:[%s1359_s0] sm:$0xff]  ;;  %v953_v6 = vld [vmem:[%s1362_s3 + $0x8] sm:$0xff]   ;;  %vm112_vm1 = vcmask 261120   ;;  %v954_v7 = vld [vmem:[%s1362_s3 + $0x10] sm:$0xff]   ;;  %s1093_s14 = smov [#allocation8]  }
  0x38   :  { %842 = vmatprep.subr.bf16.mxu1 %v1091_v0  ;;  %858 = vmatprep.mubr.msk.bf16.mxu1 %vm1092_vm0, %v1091_v0  ;;  %v952_v4 = vld [vmem:[%s1362_s3] sm:$0xff]   ;;  %v88_v5 = vpack.c.bf16 %v87_v3, %v87_v3  ;;  %v955_v8 = vld [vmem:[%s1362_s3 + $0x18] sm:$0xff]   ;;  %v957_v10 = vld [vmem:[%s1362_s3 + $0x28] sm:$0xff]  }
  0x39   :  { %835 = vmatpush3.bf16.msra.mxu0 %v950_v1  ;;  %843 = vmatpush3.bf16.msra.mxu1 %v952_v4  ;;  %v956_v9 = vld [vmem:[%s1362_s3 + $0x20] sm:$0xff]   ;;  %v958_v11 = vld [vmem:[%s1362_s3 + $0x30] sm:$0xff]   ;;  %v959_v12 = vld [vmem:[%s1362_s3 + $0x38] sm:$0xff]  }
  0x3a   :  { %836 = vmatprep.subr.bf16.mxu0 %v1091_v0  ;;  %844 = vmatprep.subr.bf16.mxu1 %v1091_v0  ;;  %v960_v13 = vld [vmem:[#allocation2] sm:$0xff]   ;;  %v961_v14 = vld [vmem:[#allocation2 + $0x8] sm:$0xff]   ;;  %v962_v15 = vld [vmem:[#allocation2 + $0x10] sm:$0xff]  }
  0x3b   :  { %v963_v16 = vld [vmem:[#allocation2 + $0x18] sm:$0xff]   ;;  %v964_v17 = vld [vmem:[#allocation2 + $0x20] sm:$0xff]   ;;  %v965_v18 = vld [vmem:[#allocation2 + $0x28] sm:$0xff]  }
  0x3c   :  { %v737_v19 = vld [vmem:[%s1361_s2] ss:$0 sm:$0xff]  ;;  %v966_v27 = vld [vmem:[#allocation2 + $0x30] sm:$0xff]   ;;  %v967_v28 = vld [vmem:[#allocation2 + $0x38] sm:$0xff]   ;;  %s727_s2 = sshll.u32 %s1093_s14, 4  ;;  %s728_s2 = int_to_ptr.vmem [resolvable:$true] %s727_s2 }
  0x3d   :  { %837 = vmatpush3.bf16.msra.mxu0 %v951_v2  ;;  %845 = vmatpush3.bf16.msra.mxu1 %v953_v6  ;;  %v968_v29 = vld [vmem:[#allocation5] sm:$0xff]   ;;  %v969_v30 = vld [vmem:[#allocation5 + $0x8] sm:$0xff]   ;;  %v970_v31 = vld [vmem:[#allocation5 + $0x10] sm:$0xff]   ;;  %p1063_p11 = scmp.lt.s32.totalorder %s728_s2, %s728_s2 }
  0x3e   :  { %862 = vmatprep.subr.bf16.mxu0 %v1091_v0  ;;  %846 = vmatprep.subr.bf16.mxu1 %v1091_v0  ;;  %v971_v32 = vld [vmem:[#allocation5 + $0x18] sm:$0xff]   ;;  %v972_v33 = vld [vmem:[#allocation5 + $0x20] sm:$0xff]   ;;  %v973_v34 = vld [vmem:[#allocation5 + $0x28] sm:$0xff]  }
  0x3f   :  { %v974_v35 = vld [vmem:[#allocation5 + $0x30] sm:$0xff]   ;;  %v741_v36 = vld [vmem:[%s1363_s4] ss:$0 sm:$0xff]  ;;  %v975_v44 = vld [vmem:[#allocation5 + $0x38] sm:$0xff]  }
  0x40   :  { %839 = vmatmul.mubr.msk.bf16.vlgmr.msra.gmra.mrb[0].mxu0 %vm112_vm1, %v88_v5  ;;  %v976_v45 = vld [vmem:[#allocation7] sm:$0xff]   ;;  %v977_v46 = vld [vmem:[#allocation7 + $0x8] sm:$0xff]   ;;  %v978_v47 = vld [vmem:[#allocation7 + $0x10] sm:$0xff]  }
  0x41   :  { %878 = vmatprep.mubr.msk.bf16.mxu0 %vm1092_vm0, %v1091_v0  ;;  %847 = vmatpush3.bf16.msra.mxu1 %v954_v7  ;;  %v979_v48 = vld [vmem:[#allocation7 + $0x18] sm:$0xff]   ;;  %v980_v49 = vld [vmem:[#allocation7 + $0x20] sm:$0xff]   ;;  %v981_v50 = vld [vmem:[#allocation7 + $0x28] sm:$0xff]  }
  0x42   :  { %848 = vmatprep.subr.bf16.mxu1 %v1091_v0  ;;  %863 = vmatpush3.bf16.msra.mxu0 %v960_v13  ;;  %v750_v51 = vld [vmem:[%s1365_s6] ss:$0 sm:$0xff]  ;;  %v982_v58 = vld [vmem:[#allocation7 + $0x30] sm:$0xff]   ;;  %v983_v59 = vld [vmem:[#allocation7 + $0x38] sm:$0xff]  }
  0x43   :  { %864 = vmatprep.subr.bf16.mxu0 %v1091_v0  ;;  %v984_v60 = vld [vmem:[%s1370_s11] sm:$0xff]   ;;  %v985_v61 = vld [vmem:[%s1370_s11 + $0x8] sm:$0xff]   ;;  %v986_v62 = vld [vmem:[%s1370_s11 + $0x10] sm:$0xff]  }
  0x44   :  { %v987_v63 = vld [vmem:[%s1370_s11 + $0x18] sm:$0xff]   ;;  %v988_v1 = vld [vmem:[%s1370_s11 + $0x20] sm:$0xff]   ;;  %v989_v2 = vld [vmem:[%s1370_s11 + $0x28] sm:$0xff]  }
  0x45   :  { %849 = vmatpush3.bf16.msra.mxu1 %v955_v8  ;;  %v759_v3 = vld [vmem:[%s1367_s8] ss:$0 sm:$0xff] }
  0x46   :  { %850 = vmatprep.subr.bf16.mxu1 %v1091_v0  ;;  %865 = vmatpush3.bf16.msra.mxu0 %v961_v14  ;;  %v768_v13 = vld [vmem:[%s1369_s10] ss:$0 sm:$0xff]  ;;  %s1058_s10 = scalar_lea.vmem %s728_s2, 128 }
  0x47   :  { %866 = vmatprep.subr.bf16.mxu0 %v1091_v0  ;;  %p1059_p10 = scmp.ne.s32.totalorder %s728_s2, %s1058_s10  ;;  %p1064_p12 = scmp.lt.s32.totalorder %s1058_s10, %s1058_s10 }
  0x49   :  { %851 = vmatpush3.bf16.msra.mxu1 %v956_v9  ;;  %p1065_p13 = por %p1064_p12, %p1063_p11 }
  0x4a   :  { %852 = vmatprep.subr.bf16.mxu1 %v1091_v0  ;;  %867 = vmatpush3.bf16.msra.mxu0 %v962_v15 }
  0x4b   :  { %868 = vmatprep.subr.bf16.mxu0 %v1091_v0  ;;  %p1066_p0 = pnand %p1065_p13, %p1059_p10 }
  0x4d   :  { %853 = vmatpush3.bf16.msra.mxu1 %v957_v10 }
  0x4e   :  { %854 = vmatprep.subr.bf16.mxu1 %v1091_v0  ;;  %869 = vmatpush3.bf16.msra.mxu0 %v963_v16 }
  0x4f   :  { %870 = vmatprep.subr.bf16.mxu0 %v1091_v0 }
  0x51   :  { %855 = vmatpush3.bf16.msra.mxu1 %v958_v11  ;;  %v990_v11 = vld [vmem:[%s1370_s11 + $0x30] sm:$0xff]  }
  0x52   :  { %856 = vmatprep.subr.bf16.mxu1 %v1091_v0  ;;  %871 = vmatpush3.bf16.msra.mxu0 %v964_v17 }
  0x53   :  { %872 = vmatprep.subr.bf16.mxu0 %v1091_v0 }
  0x55   :  { %857 = vmatpush3.bf16.msra.mxu1 %v959_v12  ;;  %v991_v12 = vld [vmem:[%s1370_s11 + $0x38] sm:$0xff]  }
  0x56   :  { %882 = vmatprep.subr.bf16.mxu1 %v1091_v0  ;;  %873 = vmatpush3.bf16.msra.mxu0 %v965_v18 }
  0x57   :  { %874 = vmatprep.subr.bf16.mxu0 %v1091_v0 }
  0x5a   :  { %875 = vmatpush3.bf16.msra.mxu0 %v966_v27 }
  0x5b   :  { %876 = vmatprep.subr.bf16.mxu0 %v1091_v0 }
  0x5e   :  { %877 = vmatpush3.bf16.msra.mxu0 %v967_v28 }
  0x5f   :  { %902 = vmatprep.subr.bf16.mxu0 %v1091_v0 }
 0x113   :  { %v150_v20 = vpop.f32.mrb[0].mxu0 }
 0x114   :  { %v151_v21 = vadd.f32 %v737_v19, %v150_v20  ;;  %v840_v22 = vpop.f32.mrb[1].mxu0 }
 0x115   :  { %v153_v23 = vpop.f32.mrb[2].mxu0 }
 0x116   :  { %v156_v24 = vmax.f32 %v151_v21, 0.0  ;;  %v841_v25 = vpop.f32.mrb[3].mxu0 }
 0x118   :  { %v157_v26 = vpack.c.bf16 %v156_v24, %v156_v24 }
 0x11a   :  { %859 = vmatmul.mubr.bf16.vlgmr.msra.gmra.mrb[0].mxu1 %v157_v26 }
 0x11b   :  { %898 = vmatprep.mubr.msk.bf16.mxu1 %vm1092_vm0, %v1091_v0  ;;  %883 = vmatpush3.bf16.msra.mxu1 %v968_v29 }
 0x11c   :  { %884 = vmatprep.subr.bf16.mxu1 %v1091_v0 }
 0x11f   :  { %885 = vmatpush3.bf16.msra.mxu1 %v969_v30 }
 0x120   :  { %886 = vmatprep.subr.bf16.mxu1 %v1091_v0 }
 0x123   :  { %887 = vmatpush3.bf16.msra.mxu1 %v970_v31 }
 0x124   :  { %888 = vmatprep.subr.bf16.mxu1 %v1091_v0 }
 0x127   :  { %889 = vmatpush3.bf16.msra.mxu1 %v971_v32 }
 0x128   :  { %890 = vmatprep.subr.bf16.mxu1 %v1091_v0 }
 0x12b   :  { %891 = vmatpush3.bf16.msra.mxu1 %v972_v33 }
 0x12c   :  { %892 = vmatprep.subr.bf16.mxu1 %v1091_v0 }
 0x12f   :  { %893 = vmatpush3.bf16.msra.mxu1 %v973_v34 }
 0x130   :  { %894 = vmatprep.subr.bf16.mxu1 %v1091_v0 }
 0x133   :  { %895 = vmatpush3.bf16.msra.mxu1 %v974_v35 }
 0x134   :  { %896 = vmatprep.subr.bf16.mxu1 %v1091_v0 }
 0x137   :  { %897 = vmatpush3.bf16.msra.mxu1 %v975_v44 }
 0x138   :  { %922 = vmatprep.subr.bf16.mxu1 %v1091_v0 }
 0x1ed   :  { %v263_v37 = vpop.f32.mrb[0].mxu1 }
 0x1ee   :  { %v264_v38 = vadd.f32 %v741_v36, %v263_v37  ;;  %v860_v39 = vpop.f32.mrb[1].mxu1 }
 0x1ef   :  { %v266_v40 = vpop.f32.mrb[2].mxu1 }
 0x1f0   :  { %v269_v41 = vmax.f32 %v264_v38, 0.0  ;;  %v861_v42 = vpop.f32.mrb[3].mxu1 }
 0x1f2   :  { %v270_v43 = vpack.c.bf16 %v269_v41, %v269_v41 }
 0x1f4   :  { %879 = vmatmul.mubr.bf16.vlgmr.msra.gmra.mrb[4].mxu0 %v270_v43 }
 0x1f5   :  { %918 = vmatprep.mubr.msk.bf16.mxu0 %vm1092_vm0, %v1091_v0  ;;  %903 = vmatpush3.bf16.msra.mxu0 %v976_v45 }
 0x1f6   :  { %904 = vmatprep.subr.bf16.mxu0 %v1091_v0 }
 0x1f9   :  { %905 = vmatpush3.bf16.msra.mxu0 %v977_v46 }
 0x1fa   :  { %906 = vmatprep.subr.bf16.mxu0 %v1091_v0 }
 0x1fd   :  { %907 = vmatpush3.bf16.msra.mxu0 %v978_v47 }
 0x1fe   :  { %908 = vmatprep.subr.bf16.mxu0 %v1091_v0 }
 0x201   :  { %909 = vmatpush3.bf16.msra.mxu0 %v979_v48 }
 0x202   :  { %910 = vmatprep.subr.bf16.mxu0 %v1091_v0 }
 0x205   :  { %911 = vmatpush3.bf16.msra.mxu0 %v980_v49 }
 0x206   :  { %912 = vmatprep.subr.bf16.mxu0 %v1091_v0 }
 0x209   :  { %913 = vmatpush3.bf16.msra.mxu0 %v981_v50 }
 0x20a   :  { %914 = vmatprep.subr.bf16.mxu0 %v1091_v0 }
 0x20d   :  { %915 = vmatpush3.bf16.msra.mxu0 %v982_v58 }
 0x20e   :  { %916 = vmatprep.subr.bf16.mxu0 %v1091_v0 }
 0x211   :  { %917 = vmatpush3.bf16.msra.mxu0 %v983_v59 }
 0x2c7   :  { %v376_v52 = vpop.f32.mrb[4].mxu0 }
 0x2c8   :  { %v377_v53 = vadd.f32 %v750_v51, %v376_v52  ;;  %v880_v54 = vpop.f32.mrb[5].mxu0 }
 0x2c9   :  { %v379_v55 = vpop.f32.mrb[6].mxu0 }
 0x2ca   :  { %v382_v56 = vpack.c.bf16 %v377_v53, %v377_v53  ;;  %v881_v57 = vpop.f32.mrb[7].mxu0 }
 0x2cc   :  { %899 = vmatmul.mubr.bf16.vlgmr.msra.gmra.mrb[4].mxu1 %v382_v56 }
 0x2cd   :  { %938 = vmatprep.mubr.msk.bf16.mxu1 %vm1092_vm0, %v1091_v0  ;;  %923 = vmatpush3.bf16.msra.mxu1 %v984_v60 }
 0x2ce   :  { %924 = vmatprep.subr.bf16.mxu1 %v1091_v0 }
 0x2d1   :  { %925 = vmatpush3.bf16.msra.mxu1 %v985_v61 }
 0x2d2   :  { %926 = vmatprep.subr.bf16.mxu1 %v1091_v0 }
 0x2d5   :  { %927 = vmatpush3.bf16.msra.mxu1 %v986_v62 }
 0x2d6   :  { %928 = vmatprep.subr.bf16.mxu1 %v1091_v0 }
 0x2d9   :  { %929 = vmatpush3.bf16.msra.mxu1 %v987_v63 }
 0x2da   :  { %930 = vmatprep.subr.bf16.mxu1 %v1091_v0 }
 0x2dd   :  { %931 = vmatpush3.bf16.msra.mxu1 %v988_v1 }
 0x2de   :  { %932 = vmatprep.subr.bf16.mxu1 %v1091_v0 }
 0x2e1   :  { %933 = vmatpush3.bf16.msra.mxu1 %v989_v2 }
 0x2e2   :  { %934 = vmatprep.subr.bf16.mxu1 %v1091_v0 }
 0x2e5   :  { %935 = vmatpush3.bf16.msra.mxu1 %v990_v11 }
 0x2e6   :  { %936 = vmatprep.subr.bf16.mxu1 %v1091_v0  ;;  %v777_v0 = vld [vmem:[%s1371_s12] ss:$0 sm:$0xff] }
 0x2e9   :  { %937 = vmatpush3.bf16.msra.mxu1 %v991_v12 }
 0x39f   :  { %v488_v4 = vpop.f32.mrb[4].mxu1 }
 0x3a0   :  { %v489_v5 = vadd.f32 %v759_v3, %v488_v4  ;;  %v900_v6 = vpop.f32.mrb[5].mxu1 }
 0x3a1   :  { %v491_v7 = vpop.f32.mrb[6].mxu1 }
 0x3a2   :  { %v494_v8 = vmax.f32 %v489_v5, 0.0  ;;  %v901_v9 = vpop.f32.mrb[7].mxu1 }
 0x3a4   :  { %v495_v10 = vpack.c.bf16 %v494_v8, %v494_v8 }
 0x3a6   :  { %919 = vmatmul.mubr.bf16.vlgmr.msra.gmra.mrb[8].mxu0 %v495_v10 }
 0x479   :  { %v601_v14 = vpop.f32.mrb[8].mxu0 }
 0x47a   :  { %v602_v15 = vadd.f32 %v768_v13, %v601_v14  ;;  %v920_v16 = vpop.f32.mrb[9].mxu0 }
 0x47b   :  { %v604_v17 = vpop.f32.mrb[10].mxu0 }
 0x47c   :  { %v607_v18 = vmax.f32 %v602_v15, 0.0  ;;  %v921_v19 = vpop.f32.mrb[11].mxu0 }
 0x47e   :  { %v608_v20 = vpack.c.bf16 %v607_v18, %v607_v18 }
 0x480   :  { %939 = vmatmul.mubr.bf16.vlgmr.msra.gmra.mrb[8].mxu1 %v608_v20 }
 0x553   :  { %v714_v21 = vpop.f32.mrb[8].mxu1 }
 0x554   :  { %v715_v22 = vadd.f32 %v777_v0, %v714_v21  ;;  %v940_v23 = vpop.f32.mrb[9].mxu1 }
 0x555   :  { %v717_v24 = vpop.f32.mrb[10].mxu1 }
 0x556   :  { %720 = vst.msk [vmem:[#allocation8] sm:$0xff] %vm112_vm1, %v715_v22  ;;  %v941_v25 = vpop.f32.mrb[11].mxu1 }
 0x557   :  { %1069 = shalt.err (!%p1066_p0)
}
 0x558   :  { %s1070_s12 = scalar_lea.hbm %s1372_s13, 128 }
 0x559   :  { %p1071_p1 = scmp.ne.s32.totalorder %s1372_s13, %s1070_s12  ;;  %p1074_p2 = scmp.lt.u32.totalorder %s1070_s12, %s1372_s13 }
 0x55b   :  { %p1076_p3 = pnand %p1074_p2, %p1071_p1 }
 0x55d   :  { %1079 = shalt.err (!%p1076_p3)
}
 0x55e   :  { %730 = dma.vmem_to_hbm [thread:$0]  %s728_s2, 128, %s1372_s13, [#allocation4]  }
 0x55f   :  { %1084 = dma.done.wait [#allocation4], 128  }
 0x560   :  { %1085 = vsyncadd [#allocation4], 4294967168 }
 0x561   :  { %734 = vsyncpa [#allocation3], 1 }
 0x562   :  { %735 = vsyncpa [#allocation6], 1 }
 0x563   :  { %736 = vsyncpa [#allocation4], 1 }

</bundles_post_ra>
